<compile_context>
chip_gen: v7x
topology: tpu7x:2x2x1
jax: 0.10.0
libtpu: 0.0.40
codegen_flags: <defaults>
</compile_context>

<pallas_src>
import functools

import jax
import jax.numpy as jnp
import numpy as np
from jax import lax
from jax.experimental import pallas as pl
from jax.experimental.pallas import tpu as pltpu


def _round_up(x, m):
    return ((x + m - 1) // m) * m


def _round_down(x, m):
    return (x // m) * m


# ---------------------------------------------------------------------------
# Main kernel ("plane" layout).  Per grid step:
#   x_ref: (C, ROWS, 128) logits tile (input dtype, e.g. bf16/f32)
#   t_ref: (ROWS, 128)    targets tile (int8/int32, pad columns = -1)
#   w_ref: (C,)           class weights in SMEM
# Outputs per-tile lane partials num/den of shape (1, 128).
# ---------------------------------------------------------------------------
def _wce_plane_kernel(x_ref, t_ref, w_ref, num_ref, den_ref, *,
                      n_classes, r_total, block_rows):
    f32 = jnp.float32
    t = t_ref[...].astype(jnp.int32)                     # (ROWS, 128)
    rows = t.shape[0]
    unroll = n_classes <= 8

    # pass 1: running max over classes (per-plane upcast only; no full f32 tile)
    def max_body(ci, m):
        return jnp.maximum(m, x_ref[ci].astype(f32))

    m = lax.fori_loop(1, n_classes, max_body, x_ref[0].astype(f32),
                      unroll=unroll)

    # pass 2: running sum-exp + target logit / target weight selection
    zeros = jnp.zeros((rows, 128), dtype=f32)

    def acc_body(ci, carry):
        s, x_t, w_t = carry
        xc = x_ref[ci].astype(f32)
        s = s + jnp.exp(xc - m)
        hit = t == ci
        x_t = jnp.where(hit, xc, x_t)
        w_t = jnp.where(hit, w_ref[ci], w_t)             # per-class SMEM scalar
        return s, x_t, w_t

    s, x_t, w_t = lax.fori_loop(0, n_classes, acc_body, (zeros, zeros, zeros),
                                unroll=unroll)

    nll = (jnp.log(s) + m) - x_t                         # lse - x_target
    num_tile = w_t * nll
    den_tile = w_t

    # Rows beyond the true extent exist only via implicit Pallas block padding
    # (garbage targets/logits) -> mask them.  Static no-op when ROWS divides R.
    if r_total % block_rows != 0:
        row0 = pl.program_id(1) * block_rows
        ridx = lax.broadcasted_iota(jnp.int32, (rows, 128), 0)
        valid = (row0 + ridx) < r_total
        num_tile = jnp.where(valid, num_tile, 0.0)
        den_tile = jnp.where(valid, den_tile, 0.0)

    # per-tile (1, 128) lane partials; cross-tile reduction happens in JAX
    num_ref[...] = jnp.sum(num_tile, axis=0, keepdims=True)
    den_ref[...] = jnp.sum(den_tile, axis=0, keepdims=True)


# ---------------------------------------------------------------------------
# Fallback kernel for plain (B, C) classification logits: batch on sublanes,
# classes on lanes (no transpose of the inputs), per-row outputs.
# ---------------------------------------------------------------------------
def _wce_rowwise_kernel(x_ref, t_ref, w_ref, wnll_ref, wsel_ref):
    x = x_ref[...].astype(jnp.float32)                   # (TB, C)
    t = t_ref[...].astype(jnp.int32)                     # (TB, 1)
    w = w_ref[...].astype(jnp.float32)                   # (1, C)
    tb, c = x.shape
    hit = lax.broadcasted_iota(jnp.int32, (tb, c), 1) == t
    m = jnp.max(x, axis=1, keepdims=True)
    lse = jnp.log(jnp.sum(jnp.exp(x - m), axis=1, keepdims=True)) + m
    x_t = jnp.sum(jnp.where(hit, x, 0.0), axis=1, keepdims=True)
    w_t = jnp.sum(jnp.where(hit, w, 0.0), axis=1, keepdims=True)
    wnll_ref[...] = w_t * (lse - x_t)
    wsel_ref[...] = w_t


def _wce_nd(inputs, targets, w_f32, target_tile_bytes):
    n, c = inputs.shape[0], inputs.shape[1]
    elem = inputs.dtype.itemsize
    x3 = inputs.reshape(n, c, -1)                        # free reshape of NCHW
    l = x3.shape[-1]

    t_dtype = jnp.int8 if c <= 127 else jnp.int32        # shrink target traffic
    t_elem = 1 if t_dtype == jnp.int8 else 4
    t2 = targets.reshape(n, -1).astype(t_dtype)

    # Minimal pad: only up to the next multiple of 128 lanes (sentinel -1 never
    # matches a class).  No padding up to the tile width.
    l128 = _round_up(l, 128)
    if l128 != l:
        x3 = jnp.pad(x3, ((0, 0), (0, 0), (0, l128 - l)))
        t2 = jnp.pad(t2, ((0, 0), (0, l128 - l)), constant_values=-1)
    r = l128 // 128
    x4 = x3.reshape(n, c, r, 128)
    t3 = t2.reshape(n, r, 128)

    # Row tile: ~target_tile_bytes of logits per step, multiple of 32 rows
    # (valid sub-tiling for f32/bf16/int8) unless it covers the full extent.
    rows_budget = max(32, _round_down(target_tile_bytes // (c * 128 * elem), 32))
    block_rows = min(rows_budget, 4096)
    if block_rows >= r:
        block_rows = r
        if n == 1 and r >= 64:                            # keep >= 2 grid steps
            half = _round_up((r + 1) // 2, 32)
            if half < r:
                block_rows = half
    gj = pl.cdiv(r, block_rows)

    # VMEM: 2x double-buffered inputs + ~5 live (ROWS,128) f32 accumulators.
    step_in = block_rows * 128 * (c * elem + t_elem)
    vmem_limit = int(min(48 << 20,
                         max(32 << 20, 2 * step_in + 6 * block_rows * 128 * 4 + (4 << 20))))

    kernel = functools.partial(_wce_plane_kernel, n_classes=c, r_total=r,
                               block_rows=block_rows)
    part_shape = jax.ShapeDtypeStruct((n, gj, 1, 128), jnp.float32)
    part_spec = pl.BlockSpec((None, None, 1, 128), lambda i, j: (i, j, 0, 0))

    num_p, den_p = pl.pallas_call(
        kernel,
        out_shape=(part_shape, part_shape),
        grid_spec=pltpu.PrefetchScalarGridSpec(
            num_scalar_prefetch=0,
            grid=(n, gj),
            in_specs=[
                pl.BlockSpec((None, c, block_rows, 128), lambda i, j: (i, 0, j, 0)),
                pl.BlockSpec((None, block_rows, 128), lambda i, j: (i, j, 0)),
                pl.BlockSpec(memory_space=pltpu.MemorySpace.SMEM),  # class weights
            ],
            out_specs=[part_spec, part_spec],
        ),
        compiler_params=pltpu.CompilerParams(
            dimension_semantics=("parallel", "parallel"),
            vmem_limit_bytes=vmem_limit,
        ),
    )(x4, t3, w_f32)
    return jnp.sum(num_p), jnp.sum(den_p)


def _wce_2d(inputs, targets, w_f32, target_tile_bytes):
    b, c = inputs.shape
    elem = inputs.dtype.itemsize
    t2 = targets.reshape(b, 1).astype(jnp.int32)
    w_row = w_f32.reshape(1, c)

    rows_budget = max(32, _round_down(target_tile_bytes // max(c * elem, 1), 32))
    tb = b if b <= rows_budget else rows_budget
    gb = pl.cdiv(b, tb)

    out_shape = jax.ShapeDtypeStruct((b, 1), jnp.float32)
    out_spec = pl.BlockSpec((tb, 1), lambda i: (i, 0))
    wnll, wsel = pl.pallas_call(
        _wce_rowwise_kernel,
        out_shape=(out_shape, out_shape),
        grid_spec=pltpu.PrefetchScalarGridSpec(
            num_scalar_prefetch=0,
            grid=(gb,),
            in_specs=[
                pl.BlockSpec((tb, c), lambda i: (i, 0)),
                pl.BlockSpec((tb, 1), lambda i: (i, 0)),
                pl.BlockSpec((1, c), lambda i: (0, 0)),
            ],
            out_specs=[out_spec, out_spec],
        ),
        compiler_params=pltpu.CompilerParams(
            dimension_semantics=("parallel",),
            vmem_limit_bytes=32 * 1024 * 1024,
        ),
    )(inputs, t2, w_row)
    return jnp.sum(wnll), jnp.sum(wsel)


def weighted_cross_entropy_loss(inputs, targets, class_weights=None,
                                reduction="mean", target_tile_bytes=4 << 20):
    """Matches F.cross_entropy(inputs, targets, weight=class_weights, reduction=...)
    for reduction in {'mean', 'sum'}.

    inputs: (N, C) or (N, C, d1, ..., dk) float logits; targets: matching int ids.
    """
    if inputs.ndim < 2:
        raise ValueError("inputs must be (N, C) or (N, C, d1, ..., dk)")
    c = inputs.shape[1]
    if class_weights is None:
        class_weights = jnp.ones((c,), dtype=jnp.float32)
    w_f32 = jnp.asarray(class_weights, dtype=jnp.float32).reshape(c)

    if inputs.ndim == 2:
        num, den = _wce_2d(inputs, targets, w_f32, target_tile_bytes)
    else:
        num, den = _wce_nd(inputs, targets, w_f32, target_tile_bytes)

    if reduction == "mean":
        return num / den       # NaN/Inf if total selected weight is 0 (matches PyTorch)
    if reduction == "sum":
        return num
    # TODO(synk): reduction='none' (per-element loss tensor) not implemented in Pallas path.
    raise NotImplementedError("reduction must be 'mean' or 'sum'")


if __name__ == "__main__":
    key = jax.random.PRNGKey(0)
    ks = jax.random.split(key, 8)

    def ref_loss(x_nc, t, w, reduction="mean"):
        # pure-JAX reference == F.cross_entropy(..., weight=w, reduction=...)
        if x_nc.ndim > 2:
            C = x_nc.shape[1]
            perm = (0,) + tuple(range(2, x_nc.ndim)) + (1,)
            x2 = jnp.transpose(x_nc, perm).reshape(-1, C).astype(jnp.float32)
            tf = t.reshape(-1)
        else:
            x2 = x_nc.astype(jnp.float32)
            tf = t
        logp = jax.nn.log_softmax(x2, axis=-1)
        nll = -jnp.take_along_axis(logp, tf[:, None], axis=-1)[:, 0]
        wi = w[tf]
        if reduction == "sum":
            return jnp.sum(wi * nll)
        return jnp.sum(wi * nll) / jnp.sum(wi)

    def check(got, want, name):
        got = np.asarray(jax.block_until_ready(got))
        want = np.asarray(want)
        assert np.allclose(got, want, rtol=1e-5, atol=1e-5), (name, got, want)

    # 1) segmentation-style NCHW, f32
    N, C, H, W = 2, 4, 16, 16
    x1 = jax.random.normal(ks[0], (N, C, H, W), dtype=jnp.float32)
    t1 = jax.random.randint(ks[1], (N, H, W), 0, C, dtype=jnp.int32)
    w1 = jnp.array([0.5, 1.0, 1.5, 2.0], dtype=jnp.float32)
    check(weighted_cross_entropy_loss(x1, t1, w1), ref_loss(x1, t1, w1), "nchw_f32")

    # 2) plain (B, C) classification (no transpose path)
    B = 8
    x2 = jax.random.normal(ks[2], (B, C), dtype=jnp.float32)
    t2 = jax.random.randint(ks[3], (B,), 0, C, dtype=jnp.int32)
    check(weighted_cross_entropy_loss(x2, t2, w1), ref_loss(x2, t2, w1), "bc_f32")

    # 3) bf16 logits, spatial not a multiple of 128 (lane pad) + masked tail row tile
    x3 = jax.random.normal(ks[4], (1, C, 100, 100), dtype=jnp.bfloat16)
    t3 = jax.random.randint(ks[5], (1, 100, 100), 0, C, dtype=jnp.int32)
    check(weighted_cross_entropy_loss(x3, t3, w1), ref_loss(x3, t3, w1), "nchw_bf16_pad")

    # 4) default (None) class weights, C > 8 (non-unrolled class loop), reduction='sum'
    C4 = 12
    x4 = jax.random.normal(ks[6], (2, C4, 16, 16), dtype=jnp.float32)
    t4 = jax.random.randint(ks[7], (2, 16, 16), 0, C4, dtype=jnp.int32)
    check(weighted_cross_entropy_loss(x4, t4, None, reduction="sum"),
          ref_loss(x4, t4, jnp.ones((C4,), jnp.float32), reduction="sum"), "sum_none_w")

    print("KERNEL_OK")
</pallas_src>

<mosaic_0001>
module attributes {stable_mosaic.version = 11 : i64} {
  func.func @_wce_plane_kernel(%arg0: i32, %arg1: i32, %arg2: memref<1x4x2x128xf32, #tpu.memory_space<vmem>>, %arg3: memref<1x2x128xi8, #tpu.memory_space<vmem>>, %arg4: memref<4xf32, #tpu.memory_space<smem>>, %arg5: memref<1x1x1x128xf32, #tpu.memory_space<vmem>>, %arg6: memref<1x1x1x128xf32, #tpu.memory_space<vmem>>) attributes {dimension_semantics = [#tpu.dimension_semantics<parallel>, #tpu.dimension_semantics<parallel>], iteration_bounds = array<i64: 2, 1>, scalar_prefetch = 0 : i64, scratch_operands = 0 : i64, tpu.core_type = #tpu.core_type<tc>, window_params = [{transform_indices = @transform_0, window_bounds = array<i64: 1, 4, 2, 128>}, {transform_indices = @transform_1, window_bounds = array<i64: 1, 2, 128>}, {transform_indices = @transform_2, window_bounds = array<i64: 4>}, {transform_indices = @transform_3, window_bounds = array<i64: 1, 1, 1, 128>}, {transform_indices = @transform_4, window_bounds = array<i64: 1, 1, 1, 128>}]} {
    %c0 = arith.constant 0 : index
    %c0_0 = arith.constant 0 : index
    %c0_1 = arith.constant 0 : index
    %0 = vector.load %arg3[%c0, %c0_0, %c0_1] : memref<1x2x128xi8, #tpu.memory_space<vmem>>, vector<1x2x128xi8>
    %1 = vector.shape_cast %0 : vector<1x2x128xi8> to vector<2x128xi8>
    %2 = arith.extsi %1 : vector<2x128xi8> to vector<2x128xi32>
    %c0_2 = arith.constant 0 : index
    %c0_3 = arith.constant 0 : index
    %c0_4 = arith.constant 0 : index
    %c0_5 = arith.constant 0 : index
    %3 = vector.load %arg2[%c0_2, %c0_3, %c0_4, %c0_5] : memref<1x4x2x128xf32, #tpu.memory_space<vmem>>, vector<1x1x2x128xf32>
    %4 = vector.shape_cast %3 : vector<1x1x2x128xf32> to vector<2x128xf32>
    %c1_i32 = arith.constant 1 : i32
    %c0_6 = arith.constant 0 : index
    %5 = arith.index_cast %c1_i32 : i32 to index
    %c0_7 = arith.constant 0 : index
    %c0_8 = arith.constant 0 : index
    %6 = vector.load %arg2[%c0_6, %5, %c0_7, %c0_8] : memref<1x4x2x128xf32, #tpu.memory_space<vmem>>, vector<1x1x2x128xf32>
    %7 = vector.shape_cast %6 : vector<1x1x2x128xf32> to vector<2x128xf32>
    %8 = arith.maximumf %4, %7 : vector<2x128xf32>
    %c2_i32 = arith.constant 2 : i32
    %c0_9 = arith.constant 0 : index
    %9 = arith.index_cast %c2_i32 : i32 to index
    %c0_10 = arith.constant 0 : index
    %c0_11 = arith.constant 0 : index
    %10 = vector.load %arg2[%c0_9, %9, %c0_10, %c0_11] : memref<1x4x2x128xf32, #tpu.memory_space<vmem>>, vector<1x1x2x128xf32>
    %11 = vector.shape_cast %10 : vector<1x1x2x128xf32> to vector<2x128xf32>
    %12 = arith.maximumf %8, %11 : vector<2x128xf32>
    %c3_i32 = arith.constant 3 : i32
    %c0_12 = arith.constant 0 : index
    %13 = arith.index_cast %c3_i32 : i32 to index
    %c0_13 = arith.constant 0 : index
    %c0_14 = arith.constant 0 : index
    %14 = vector.load %arg2[%c0_12, %13, %c0_13, %c0_14] : memref<1x4x2x128xf32, #tpu.memory_space<vmem>>, vector<1x1x2x128xf32>
    %15 = vector.shape_cast %14 : vector<1x1x2x128xf32> to vector<2x128xf32>
    %16 = arith.maximumf %12, %15 : vector<2x128xf32>
    %c3_i32_15 = arith.constant 3 : i32
    %cst = arith.constant 0.000000e+00 : f32
    %17 = vector.broadcast %cst : f32 to vector<2x128xf32>
    %c0_i32 = arith.constant 0 : i32
    %c0_16 = arith.constant 0 : index
    %18 = arith.index_cast %c0_i32 : i32 to index
    %c0_17 = arith.constant 0 : index
    %c0_18 = arith.constant 0 : index
    %19 = vector.load %arg2[%c0_16, %18, %c0_17, %c0_18] : memref<1x4x2x128xf32, #tpu.memory_space<vmem>>, vector<1x1x2x128xf32>
    %20 = vector.shape_cast %19 : vector<1x1x2x128xf32> to vector<2x128xf32>
    %21 = arith.subf %20, %16 : vector<2x128xf32>
    %22 = math.exp %21 : vector<2x128xf32>
    %23 = arith.addf %17, %22 : vector<2x128xf32>
    %24 = vector.broadcast %c0_i32 : i32 to vector<2x128xi32>
    %25 = arith.cmpi eq, %2, %24 : vector<2x128xi32>
    %26 = arith.select %25, %20, %17 : vector<2x128xi1>, vector<2x128xf32>
    %27 = arith.index_cast %c0_i32 : i32 to index
    %28 = memref.load %arg4[%27] : memref<4xf32, #tpu.memory_space<smem>>
    %29 = vector.broadcast %28 : f32 to vector<2x128xf32>
    %30 = arith.select %25, %29, %17 : vector<2x128xi1>, vector<2x128xf32>
    %c1_i32_19 = arith.constant 1 : i32
    %c0_20 = arith.constant 0 : index
    %31 = arith.index_cast %c1_i32_19 : i32 to index
    %c0_21 = arith.constant 0 : index
    %c0_22 = arith.constant 0 : index
    %32 = vector.load %arg2[%c0_20, %31, %c0_21, %c0_22] : memref<1x4x2x128xf32, #tpu.memory_space<vmem>>, vector<1x1x2x128xf32>
    %33 = vector.shape_cast %32 : vector<1x1x2x128xf32> to vector<2x128xf32>
    %34 = arith.subf %33, %16 : vector<2x128xf32>
    %35 = math.exp %34 : vector<2x128xf32>
    %36 = arith.addf %23, %35 : vector<2x128xf32>
    %37 = vector.broadcast %c1_i32_19 : i32 to vector<2x128xi32>
    %38 = arith.cmpi eq, %2, %37 : vector<2x128xi32>
    %39 = arith.select %38, %33, %26 : vector<2x128xi1>, vector<2x128xf32>
    %40 = arith.index_cast %c1_i32_19 : i32 to index
    %41 = memref.load %arg4[%40] : memref<4xf32, #tpu.memory_space<smem>>
    %42 = vector.broadcast %41 : f32 to vector<2x128xf32>
    %43 = arith.select %38, %42, %30 : vector<2x128xi1>, vector<2x128xf32>
    %c2_i32_23 = arith.constant 2 : i32
    %c0_24 = arith.constant 0 : index
    %44 = arith.index_cast %c2_i32_23 : i32 to index
    %c0_25 = arith.constant 0 : index
    %c0_26 = arith.constant 0 : index
    %45 = vector.load %arg2[%c0_24, %44, %c0_25, %c0_26] : memref<1x4x2x128xf32, #tpu.memory_space<vmem>>, vector<1x1x2x128xf32>
    %46 = vector.shape_cast %45 : vector<1x1x2x128xf32> to vector<2x128xf32>
    %47 = arith.subf %46, %16 : vector<2x128xf32>
    %48 = math.exp %47 : vector<2x128xf32>
    %49 = arith.addf %36, %48 : vector<2x128xf32>
    %50 = vector.broadcast %c2_i32_23 : i32 to vector<2x128xi32>
    %51 = arith.cmpi eq, %2, %50 : vector<2x128xi32>
    %52 = arith.select %51, %46, %39 : vector<2x128xi1>, vector<2x128xf32>
    %53 = arith.index_cast %c2_i32_23 : i32 to index
    %54 = memref.load %arg4[%53] : memref<4xf32, #tpu.memory_space<smem>>
    %55 = vector.broadcast %54 : f32 to vector<2x128xf32>
    %56 = arith.select %51, %55, %43 : vector<2x128xi1>, vector<2x128xf32>
    %c3_i32_27 = arith.constant 3 : i32
    %c0_28 = arith.constant 0 : index
    %57 = arith.index_cast %c3_i32_27 : i32 to index
    %c0_29 = arith.constant 0 : index
    %c0_30 = arith.constant 0 : index
    %58 = vector.load %arg2[%c0_28, %57, %c0_29, %c0_30] : memref<1x4x2x128xf32, #tpu.memory_space<vmem>>, vector<1x1x2x128xf32>
    %59 = vector.shape_cast %58 : vector<1x1x2x128xf32> to vector<2x128xf32>
    %60 = arith.subf %59, %16 : vector<2x128xf32>
    %61 = math.exp %60 : vector<2x128xf32>
    %62 = arith.addf %49, %61 : vector<2x128xf32>
    %63 = vector.broadcast %c3_i32_27 : i32 to vector<2x128xi32>
    %64 = arith.cmpi eq, %2, %63 : vector<2x128xi32>
    %65 = arith.select %64, %59, %52 : vector<2x128xi1>, vector<2x128xf32>
    %66 = arith.index_cast %c3_i32_27 : i32 to index
    %67 = memref.load %arg4[%66] : memref<4xf32, #tpu.memory_space<smem>>
    %68 = vector.broadcast %67 : f32 to vector<2x128xf32>
    %69 = arith.select %64, %68, %56 : vector<2x128xi1>, vector<2x128xf32>
    %c4_i32 = arith.constant 4 : i32
    %70 = math.log %62 : vector<2x128xf32>
    %71 = arith.addf %70, %16 : vector<2x128xf32>
    %72 = arith.subf %71, %65 : vector<2x128xf32>
    %73 = arith.mulf %69, %72 : vector<2x128xf32>
    %cst_31 = arith.constant dense<0.000000e+00> : vector<128xf32>
    %74 = vector.multi_reduction <add>, %73, %cst_31 [0] : vector<2x128xf32> to vector<128xf32>
    %75 = vector.shape_cast %74 : vector<128xf32> to vector<1x128xf32>
    %c0_32 = arith.constant 0 : index
    %c0_33 = arith.constant 0 : index
    %c0_34 = arith.constant 0 : index
    %c0_35 = arith.constant 0 : index
    %76 = vector.load %arg5[%c0_32, %c0_33, %c0_34, %c0_35] : memref<1x1x1x128xf32, #tpu.memory_space<vmem>>, vector<1x1x1x128xf32>
    %77 = vector.shape_cast %76 : vector<1x1x1x128xf32> to vector<1x128xf32>
    %78 = vector.shape_cast %75 : vector<1x128xf32> to vector<1x1x1x128xf32>
    tpu.vector_store %arg5[%c0_32, %c0_33, %c0_34, %c0_35], %78 {strides = array<i32>} : memref<1x1x1x128xf32, #tpu.memory_space<vmem>>, vector<1x1x1x128xf32>,
    %cst_36 = arith.constant dense<0.000000e+00> : vector<128xf32>
    %79 = vector.multi_reduction <add>, %69, %cst_36 [0] : vector<2x128xf32> to vector<128xf32>
    %80 = vector.shape_cast %79 : vector<128xf32> to vector<1x128xf32>
    %c0_37 = arith.constant 0 : index
    %c0_38 = arith.constant 0 : index
    %c0_39 = arith.constant 0 : index
    %c0_40 = arith.constant 0 : index
    %81 = vector.load %arg6[%c0_37, %c0_38, %c0_39, %c0_40] : memref<1x1x1x128xf32, #tpu.memory_space<vmem>>, vector<1x1x1x128xf32>
    %82 = vector.shape_cast %81 : vector<1x1x1x128xf32> to vector<1x128xf32>
    %83 = vector.shape_cast %80 : vector<1x128xf32> to vector<1x1x1x128xf32>
    tpu.vector_store %arg6[%c0_37, %c0_38, %c0_39, %c0_40], %83 {strides = array<i32>} : memref<1x1x1x128xf32, #tpu.memory_space<vmem>>, vector<1x1x1x128xf32>,
    return
  }
  func.func @transform_0(%arg0: i32, %arg1: i32) -> (i32, i32, i32, i32) {
    %c0_i32 = arith.constant 0 : i32
    %c0_i32_0 = arith.constant 0 : i32
    %c0_i32_1 = arith.constant 0 : i32
    return %arg0, %c0_i32, %arg1, %c0_i32_0 : i32, i32, i32, i32
  }
  func.func @transform_1(%arg0: i32, %arg1: i32) -> (i32, i32, i32) {
    %c0_i32 = arith.constant 0 : i32
    %c0_i32_0 = arith.constant 0 : i32
    return %arg0, %arg1, %c0_i32 : i32, i32, i32
  }
  func.func @transform_2(%arg0: i32, %arg1: i32) -> i32 {
    %c0_i32 = arith.constant 0 : i32
    %c0_i32_0 = arith.constant 0 : i32
    return %c0_i32 : i32
  }
  func.func @transform_3(%arg0: i32, %arg1: i32) -> (i32, i32, i32, i32) {
    %c0_i32 = arith.constant 0 : i32
    %c0_i32_0 = arith.constant 0 : i32
    %c0_i32_1 = arith.constant 0 : i32
    return %arg0, %arg1, %c0_i32, %c0_i32_0 : i32, i32, i32, i32
  }
  func.func @transform_4(%arg0: i32, %arg1: i32) -> (i32, i32, i32, i32) {
    %c0_i32 = arith.constant 0 : i32
    %c0_i32_0 = arith.constant 0 : i32
    %c0_i32_1 = arith.constant 0 : i32
    return %arg0, %arg1, %c0_i32, %c0_i32_0 : i32, i32, i32, i32
  }
}

</mosaic_0001>

<bundles_post_ra>
// kernel: tpu_custom_call.1
= control target key start
LH: loop header
LB: loop body
LE: loop exit
PB: predicated region body
PF: predicated region fallthrough
CT: control target
= control target key end

     0   :  { %10 = vsyncpa [#allocation3], 0  ;;  %s1124_s0 = inlined_call_operand.hbm [shape: f32[2,4,2,128], index: 0, kind: input, shape index: {}]   ;;  %s1125_s1 = inlined_call_operand.vmem [shape: s8[2,2,128], index: 1, kind: input, shape index: {}]   ;;  %s1126_s2 = inlined_call_operand.vmem [shape: f32[4], index: 2, kind: input, shape index: {}]   ;;  %s1127_s3 = inlined_call_operand.hbm [shape: f32[2,1,1,128], index: 3, kind: output, shape index: {0}]   ;;  %s1128_s4 = inlined_call_operand.hbm [shape: f32[2,1,1,128], index: 4, kind: output, shape index: {1}]  }
   0x1   :  { %12 = vsyncpa [#allocation3 + $0x1], 0 }
   0x2   :  { %13 = vsyncpa [#allocation5], 0 }
   0x3   :  { %14 = vsyncpa [#allocation4], 0 }
   0x4   :  { %16 = vsyncpa [#allocation4 + $0x1], 0 }
   0x5   :  { %17 = vsyncpa [#allocation9], 0 }
   0x6   :  { %19 = vsyncpa [#allocation9 + $0x1], 0  ;;  %s823_s15 = smov 0   ;;  %s825_s16 = smov 0  }
   0x7   :  { %s827_s17 = smov 0   ;;  %s829_s18 = smov 0  }
   0x8   :  { %s831_s19 = smov 0   ;;  %s833_s20 = smov 0  }
   0x9 LB: > { %s515_s21 = sadd.s32 4294967295, %s790_s20   ;;  %s516_s22 = sadd.s32 4294967294, %s790_s20   ;;  %s790_s20 = sphi %s833_s20, %s25_s20   ;;  %s786_s19 = sphi %s831_s19, %s1151_s19   ;;  %s782_s18 = sphi %s829_s18, %s1150_s18   ;;  %s778_s17 = sphi %s827_s17, %s1149_s17   ;;  %s774_s16 = sphi %s825_s16, %s1148_s16   ;;  %s770_s15 = sphi %s823_s15, %s1147_s15  }
   0xa   : > { %s46_s23 = sadd.s32 1, %s778_s17  ;;  %p53_p0 = scmp.ne.s32.totalorder %s778_s17, %s774_s16 }
   0xb   : > { %p54_p1 = scmp.eq.s32.totalorder %s790_s20, 0  ;;  %p59_p2 = scmp.ne.s32.totalorder %s774_s16, %s770_s15 }
   0xc   : > { %p861_p3 = scmp.eq.s32.totalorder %s515_s21, 0  ;;  %p134_p4 = scmp.eq.s32.totalorder %s515_s21, 1 }
   0xd   : > { %p865_p5 = por %p54_p1, %p53_p0  ;;  %p140_p6 = scmp.eq.s32.totalorder %s516_s22, 1 }
   0xe   : > { %s1133_s24 = scalar_select %p861_p3, 1, 0 }
   0xf   : > { %p871_p7 = por %p861_p3, %p59_p2  ;;  %p875_p8 = por %p134_p4, %p53_p0 }
  0x10   : > { %p879_p9 = por %p140_p6, %p59_p2  ;;  %p517_p10 = scmp.ge.s32.totalorder %s790_s20, 1 }
  0x11   : > { %s1135_s26 = scalar_select %p871_p7, 1, 0 }
  0x12   : > { %s1136_s27 = scalar_select %p875_p8, 1, 0 }
  0x13   : > { %s1137_s28 = scalar_select %p879_p9, 1, 0 }
  0x14   : > { %p175_p11 = scmp.lt.s32.totalorder %s790_s20, 3  ;;  %s188_s5 = sshll.u32 %s1126_s2, 4  ;;  %s189_s5 = int_to_ptr.vmem [resolvable:$true] %s188_s5 }
  0x15   : > { %p563_p0 = scmp.lt.s32.totalorder %s790_s20, 2  ;;  %s37_s9 = sadd.s32 1, %s786_s19 }
  0x16   : > { %p888_p12 = pnand %p517_p10, %p175_p11  ;;  %p909_p6 = scmp.ge.s32.totalorder %s37_s9, 2 }
  0x17   : > { %p898_p2 = pnand %p563_p0, %p865_p5  ;;  %s199_s11 = sand.u32 1, %s778_s17  }
  0x18   : > { %p547_p1 = pneg %p888_p12  ;;  %s627_s12 = scalar_lea.vmem %s189_s5, 16 }
  0x19   : > { %p628_p10 = scmp.ne.s32.totalorder %s189_s5, %s627_s12  ;;  %p635_p13 = scmp.lt.s32.totalorder %s189_s5, %s189_s5 }
  0x1a   : > { %p904_p4 = pnand %p547_p1, %p861_p3  ;;  %p636_p9 = scmp.lt.s32.totalorder %s627_s12, %s627_s12 }
  0x1c   : > { %p629_p11 = pneg %p904_p4  ;;  %p637_p8 = por %p636_p9, %p635_p13 }
  0x1e   : > { %p630_p5 = pnand %p629_p11, %p628_p10 }
  0x20   : > { %p631_p0 = pneg %p630_p5 }
  0x22   : > { %p638_p1 = pnand %p637_p8, %p631_p0 }
  0x24   : > { %641 = shalt.err (!%p638_p1)
}
  0x25   : > { %s792_s13 = smov [#allocation6]   ;;  %s1153_s9 = smov (%p909_p6, %s37_s9), 0 }
  0x26   : > { %550 = dma.vmem_to_smem (!%p904_p4), %s189_s5, 16, %s792_s13, [#allocation5]  }
  0x27   : > { %s520_s14 = sshll.u32 %s199_s11, 3  ;;  %s41_s21 = ssub.s32 %s786_s19, %s1153_s9 }
  0x28   : > { %p44_p9 = scmp.eq.s32.totalorder %s41_s21, 0  ;;  %s536_s22 = sshll.u32 %s786_s19, 7 }
  0x29   : > { %s928_s30 = scalar_lea.hbm %s1124_s0, %s536_s22  ;;  %s203_s8 = scalar_lea.vmem [#allocation2], %s520_s14 }
  0x2a   : > { %s211_s12 = sshll.u32 %s203_s8, 4  ;;  %s937_s10 = scalar_lea.sflag [#allocation3], %s199_s11  ;;  %s935_s12 = int_to_ptr.vmem [resolvable:$true] %s211_s12 }
  0x2b   : > { %s933_s5 = scalar_select %p44_p9, %s778_s17, %s46_s23  }
  0x2c   : > { %s642_s13 = scalar_lea.hbm %s928_s30, 128  ;;  %p644_p13 = pneg %p898_p2 }
  0x2d   : > { %p643_p8 = scmp.ne.s32.totalorder %s928_s30, %s642_s13  ;;  %s647_s14 = scalar_lea.hbm %s1124_s0, 256 }
  0x2e   : > { %p648_p10 = scmp.lt.u32.totalorder %s928_s30, %s1124_s0  ;;  %p649_p11 = scmp.lt.u32.totalorder %s647_s14, %s642_s13 }
  0x2f   : > { %p645_p4 = pnand %p644_p13, %p643_p8  ;;  %p651_p0 = scmp.lt.u32.totalorder %s642_s13, %s928_s30 }
  0x30   : > { %p650_p5 = por %p649_p11, %p648_p10 }
  0x31   : > { %p646_p6 = pneg %p645_p4 }
  0x32   : > { %p652_p1 = por %p651_p0, %p650_p5 }
  0x34   : > { %p653_p9 = pnand %p652_p1, %p646_p6 }
  0x36   : > { %656 = shalt.err (!%p653_p9)
}
  0x37   : > { %s657_s23 = scalar_lea.vmem %s935_s12, 128  ;;  %s793_s11 = smov [#allocation2]  }
  0x38   : > { %p658_p8 = scmp.ne.s32.totalorder %s935_s12, %s657_s23  ;;  %s662_s8 = sshll.u32 %s793_s11, 4  ;;  %s663_s8 = int_to_ptr.vmem [resolvable:$false] %s662_s8 }
  0x39   : > { %s664_s21 = scalar_lea.vmem %s663_s8, 256  ;;  %p665_p7 = scmp.lt.s32.totalorder %s935_s12, %s663_s8 }
  0x3a   : > { %p660_p4 = pnand %p658_p8, %p644_p13  ;;  %p666_p10 = scmp.lt.s32.totalorder %s664_s21, %s657_s23 }
  0x3c   : > { %p661_p3 = pneg %p660_p4  ;;  %p667_p11 = por %p666_p10, %p665_p7 }
  0x3e   : > { %p668_p5 = pnand %p667_p11, %p661_p3 }
  0x40   : > { %671 = shalt.err (!%p668_p5)
}
  0x41   : > { %s794_s13 = smov 32   ;;  %s795_s22 = smov 2  }
  0x42   : > { %554 = dma.hbm_to_vmem [thread:$0]  (!%p898_p2), %s928_s30, 128, %s935_s12, %s937_s10, %s794_s13, %s794_s13, %s795_s22  }
  0x43   : > { %232 = sbr.rel (%p888_p12) target bundleno = 166 (0xa6), region = 32  ;;  %s968_s14 = sand.u32 (!%p888_p12), 1, %s774_s16  }
  0x44   : > { %s524_s25 = sshll.u32 (!%p888_p12), %s968_s14, 3  ;;  %s235_s29 = scalar_lea.sflag (!%p888_p12), [#allocation3], %s968_s14 }
  0x45   : > { %s238_s23 = scalar_lea.vmem (!%p888_p12), [#allocation2], %s524_s25  ;;  %p1142_p3 = scmp.ne.s32.totalorder (!%p888_p12), %s1135_s26, 0 }
  0x4a   : > { %753 = dma.done.wait (%p1142_p3), %s235_s29, 128  }
  0x4b   : > { %755 = vsyncadd (%p1142_p3), %s235_s29, 4294967168  ;;  %p1143_p7 = scmp.ne.s32.totalorder %s1133_s24, 0 }
  0x4d   : > { %757 = dma.done.wait (%p1143_p7), [#allocation5], 16  }
  0x4e   : > { %759 = vsyncadd (%p1143_p7), [#allocation5], 4294967280 }
  0x4f   : > { %247 = sfence }
  0x50   : > { %p277_p12 = scmp.lt.s32.totalorder %s782_s18, 1  ;;  %v981_v0 = vld [vmem:[%s238_s23] sm:$0x3]  ;;  %v983_v1 = vld [vmem:[%s238_s23 + $0x2] sm:$0x3]  ;;  %s301_s26 = sld [smem:[#allocation6]] }
  0x51   : > { %v288_v2 = vmax.f32 %v981_v0, %v983_v1  ;;  %v987_v3 = vld [vmem:[%s238_s23 + $0x4] sm:$0x3]  ;;  %v990_v4 = vld [vmem:[%s238_s23 + $0x6] sm:$0x3]  ;;  %s529_s24 = sld [smem:[#allocation6 + $0x1]]  ;;  %s530_s7 = sld [smem:[#allocation6 + $0x2]] }
  0x52   : > { %s278_s6 = scalar_select %p277_p12, %s782_s18, 1  ;;  %vm336_vm1 = vcmask 1041408  }
  0x53   : > { %v291_v5 = vmax.f32 %v288_v2, %v987_v3  ;;  %s531_s11 = sld [smem:[#allocation6 + $0x3]]  ;;  %s276_s8 = scalar_lea.vmem [#allocation8], %s968_s14 }
  0x54   : > { %s282_s10 = scalar_lea.vmem %s1125_s1, %s278_s6  ;;  %s385_s21 = sshll.u32 %s276_s8, 4  ;;  %s1024_s21 = int_to_ptr.vmem [resolvable:$true] %s385_s21 }
  0x55   : > { %v283_v6 = vld [vmem:[%s282_s10] sm:$0x1]  ;;  %v997_v7 = vmax.f32 %v291_v5, %v990_v4  ;;  %s532_s13 = sshll.u32 %s782_s18, 4  ;;  %s358_s23 = scalar_lea.sflag [#allocation9], %s968_s14 }
  0x56   : > { %v999_v8 = vunpack.c.0.s8 %v283_v6  ;;  %v302_v10 = vstv %s301_s26  ;;  %s1031_s29 = scalar_lea.hbm %s1128_s4, %s532_s13  ;;  %s672_s26 = scalar_lea.vmem %s1024_s21, 16 }
  0x57   : > { %v295_v9 = vsub.f32 %v981_v0, %v997_v7  ;;  %v304_v11 = vsub.f32 %v983_v1, %v997_v7  ;;  %v313_v12 = vsub.f32 %v987_v3, %v997_v7  ;;  %v322_v13 = vsub.f32 %v990_v4, %v997_v7  ;;  %p673_p2 = scmp.ne.s32.totalorder %s1024_s21, %s672_s26  ;;  %p1144_p13 = scmp.ne.s32.totalorder %s1136_s27, 0 }
  0x58   : > { %vm299_vm0 = vcmp.eq.s32.totalorder %v999_v8, 0  ;;  %vm308_vm2 = vcmp.eq.s32.totalorder %v999_v8, 1  ;;  %v311_v17 = vstv %s529_s24  ;;  %v320_v19 = vstv %s530_s7  ;;  %s796_s6 = smov [#allocation8]  }
  0x59   : > { %v296_v14 = vmul.f32 1.442695, %v295_v9  ;;  %v303_v15 = vsel %vm299_vm0, %v302_v10, 0.0  ;;  %v305_v16 = vmul.f32 1.442695, %v304_v11  ;;  %vm317_vm3 = vcmp.eq.s32.totalorder %v999_v8, 2  ;;  %p674_p6 = pnand %p673_p2, %p1144_p13 }
  0x5a   : > { %v314_v18 = vmul.f32 1.442695, %v313_v12  ;;  %v312_v20 = vsel %vm308_vm2, %v311_v17, %v303_v15  ;;  %v323_v21 = vmul.f32 1.442695, %v322_v13  ;;  %vm326_vm4 = vcmp.eq.s32.totalorder %v999_v8, 3  ;;  %s676_s24 = sshll.u32 %s796_s6, 4  ;;  %s677_s24 = int_to_ptr.vmem [resolvable:$false] %s676_s24 }
  0x5b   : > { %617 = vpow2.f32 %v296_v14  ;;  %v321_v22 = vsel %vm317_vm3, %v320_v19, %v312_v20  ;;  %v329_v23 = vstv %s531_s11  ;;  %p675_p0 = pneg %p674_p6  ;;  %s678_s7 = scalar_lea.vmem %s677_s24, 32 }
  0x5c   : > { %619 = vpow2.f32 %v305_v16  ;;  %v330_v24 = vsel %vm326_vm4, %v329_v23, %v321_v22  ;;  %p679_p1 = scmp.lt.s32.totalorder %s1024_s21, %s677_s24  ;;  %p680_p9 = scmp.lt.s32.totalorder %s678_s7, %s672_s26 }
  0x5d   : > { %621 = vpow2.f32 %v314_v18  ;;  %v345_v25 = vsel %vm336_vm1, %v330_v24, 0.0 }
  0x5e   : > { %623 = vpow2.f32 %v323_v21  ;;  %v346_v26 = vrot.slane %v345_v25, 4  ;;  %p681_p8 = por %p680_p9, %p679_p1 }
  0x60   : > { %v347_v27 = vadd.f32 %v346_v26, %v345_v25  ;;  %p682_p4 = pnand %p681_p8, %p675_p0 }
  0x62   : > { %v348_v28 = vrot.slane %v347_v27, 2 }
  0x64   : > { %v349_v30 = vadd.f32 %v348_v28, %v347_v27 }
  0x65   : > { %v618_v29 = vpop.eup %617 }
  0x66   : > { %v620_v31 = vpop.eup %619  ;;  %v350_v34 = vrot.slane %v349_v30, 1 }
  0x67   : > { %v622_v32 = vpop.eup %621  ;;  %v307_v33 = vadd.f32 %v620_v31, %v618_v29 }
  0x68   : > { %v624_v35 = vpop.eup %623  ;;  %v351_v37 = vadd.f32 %v350_v34, %v349_v30 }
  0x69   : > { %v316_v36 = vadd.f32 %v622_v32, %v307_v33 }
  0x6a   : > { %352 = vst [vmem:[%s276_s8] sm:$0x1] %v351_v37 }
  0x6b   : > { %v325_v38 = vadd.f32 %v624_v35, %v316_v36 }
  0x6c   : > { %685 = shalt.err (!%p682_p4)
}
  0x6d   : > { %s686_s30 = scalar_lea.hbm %s1031_s29, 16  ;;  %s690_s11 = scalar_lea.hbm %s1128_s4, 32 }
  0x6e   : > { %p687_p10 = scmp.ne.s32.totalorder %s1031_s29, %s686_s30  ;;  %p691_p3 = scmp.lt.u32.totalorder %s1031_s29, %s1128_s4 }
  0x6f   : > { %p692_p7 = scmp.lt.u32.totalorder %s690_s11, %s686_s30  ;;  %p694_p2 = scmp.lt.u32.totalorder %s686_s30, %s1031_s29 }
  0x70   : > { %p688_p11 = pnand %p687_p10, %p1144_p13 }
  0x71   : > { %p693_p12 = por %p692_p7, %p691_p3 }
  0x72   : > { %p689_p5 = pneg %p688_p11 }
  0x73   : > { %p695_p6 = por %p694_p2, %p693_p12 }
  0x75   : > { %p696_p0 = pnand %p695_p6, %p689_p5 }
  0x77   : > { %699 = shalt.err (!%p696_p0)
}
  0x78   : > { %544 = dma.vmem_to_hbm [thread:$0]  (%p1144_p13), %s1024_s21, 16, %s1031_s29, %s358_s23   ;;  %625 = vlog2.f32 %v325_v38  ;;  %v300_v39 = vsel %vm299_vm0, %v981_v0, 0.0 }
  0x79   : > { %v309_v40 = vsel %vm308_vm2, %v983_v1, %v300_v39  ;;  %s270_s21 = scalar_lea.vmem [#allocation7], %s968_s14  ;;  %s1077_s26 = scalar_lea.hbm %s1127_s3, %s532_s13 }
  0x7a   : > { %v318_v41 = vsel %vm317_vm3, %v987_v3, %v309_v40  ;;  %s371_s25 = sshll.u32 %s270_s21, 4  ;;  %s354_s6 = scalar_lea.sflag [#allocation4], %s968_s14  ;;  %s1070_s25 = int_to_ptr.vmem [resolvable:$true] %s371_s25 }
  0x7b   : > { %v327_v44 = vsel %vm326_vm4, %v990_v4, %v318_v41  ;;  %s700_s24 = scalar_lea.vmem %s1070_s25, 16  ;;  %s797_s7 = smov [#allocation7]  }
  0x7c   : > { %p701_p1 = scmp.ne.s32.totalorder %s1070_s25, %s700_s24  ;;  %s704_s30 = sshll.u32 %s797_s7, 4  ;;  %s705_s30 = int_to_ptr.vmem [resolvable:$false] %s704_s30 }
  0x7d   : > { %s706_s12 = scalar_lea.vmem %s705_s30, 32  ;;  %p707_p4 = scmp.lt.s32.totalorder %s1070_s25, %s705_s30 }
  0x7e   : > { %p702_p9 = pnand %p701_p1, %p1144_p13  ;;  %p708_p10 = scmp.lt.s32.totalorder %s706_s12, %s700_s24 }
  0x80   : > { %p703_p8 = pneg %p702_p9  ;;  %p709_p11 = por %p708_p10, %p707_p4 }
  0x82   : > { %v626_v42 = vpop.eup %625  ;;  %p710_p5 = pnand %p709_p11, %p703_p8 }
  0x83   : > { %v332_v43 = vmul.f32 0.6931472, %v626_v42 }
  0x85   : > { %v333_v45 = vadd.f32 %v332_v43, %v997_v7 }
  0x87   : > { %v334_v46 = vsub.f32 %v333_v45, %v327_v44 }
  0x89   : > { %v335_v47 = vmul.f32 %v334_v46, %v330_v24 }
  0x8b   : > { %v337_v48 = vsel %vm336_vm1, %v335_v47, 0.0 }
  0x8c   : > { %v338_v49 = vrot.slane %v337_v48, 4 }
  0x8e   : > { %v339_v50 = vadd.f32 %v338_v49, %v337_v48 }
  0x90   : > { %v340_v51 = vrot.slane %v339_v50, 2 }
  0x92   : > { %v341_v52 = vadd.f32 %v340_v51, %v339_v50 }
  0x94   : > { %v342_v53 = vrot.slane %v341_v52, 1 }
  0x96   : > { %v343_v54 = vadd.f32 %v342_v53, %v341_v52 }
  0x98   : > { %344 = vst [vmem:[%s270_s21] sm:$0x1] %v343_v54 }
  0x99   : > { %713 = shalt.err (!%p710_p5)
}
  0x9a   : > { %s714_s18 = scalar_lea.hbm %s1077_s26, 16  ;;  %s718_s10 = scalar_lea.hbm %s1127_s3, 32 }
  0x9b   : > { %p715_p3 = scmp.ne.s32.totalorder %s1077_s26, %s714_s18  ;;  %p719_p2 = scmp.lt.u32.totalorder %s1077_s26, %s1127_s3 }
  0x9c   : > { %p720_p6 = scmp.lt.u32.totalorder %s718_s10, %s714_s18  ;;  %p722_p1 = scmp.lt.u32.totalorder %s714_s18, %s1077_s26 }
  0x9d   : > { %p716_p7 = pnand %p715_p3, %p1144_p13 }
  0x9e   : > { %p721_p0 = por %p720_p6, %p719_p2 }
  0x9f   : > { %p717_p12 = pneg %p716_p7 }
  0xa0   : > { %p723_p9 = por %p722_p1, %p721_p0 }
  0xa2   : > { %p724_p8 = pnand %p723_p9, %p717_p12 }
  0xa4   : > { %727 = shalt.err (!%p724_p8)
}
  0xa5   : > { %543 = dma.vmem_to_hbm [thread:$0]  (%p1144_p13), %s1070_s25, 16, %s1077_s26, %s354_s6  }
  0xa6 PF: > { %s397_s22 = sand.u32 1, %s770_s15   ;;  %p1145_p4 = scmp.ne.s32.totalorder %s1137_s28, 0 }
  0xa7   : > { %p1146_p10 = scmp.ge.s32.totalorder %s790_s20, 2  ;;  %s398_s21 = scalar_lea.sflag [#allocation4], %s397_s22 }
  0xa9   : > { %p556_p11 = pnand %p1146_p10, %p1145_p4 }
  0xab   : > { %761 = dma.done.wait (!%p556_p11), %s398_s21, 16  }
  0xac   : > { %763 = vsyncadd (!%p556_p11), %s398_s21, 4294967280  ;;  %s406_s29 = scalar_lea.sflag [#allocation9], %s397_s22 }
  0xad   : > { %765 = dma.done.wait (!%p556_p11), %s406_s29, 16  }
  0xae   : > { %767 = vsyncadd (!%p556_p11), %s406_s29, 4294967280  ;;  %s25_s20 = sadd.s32 1, %s790_s20   ;;  %s1147_s15 = smov %s774_s16 }
  0xaf   : > { %p22_p5 = scmp.ge.s32.totalorder %s25_s20, 4   ;;  %s1148_s16 = smov %s778_s17 }
  0xb0   : > { %s1149_s17 = smov %s933_s5  ;;  %s1150_s18 = smov %s786_s19 }
  0xb1   : > { %s1151_s19 = smov %s1153_s9  ;;  %24 = sbr.rel (!%p22_p5) target bundleno = 9 (0x9), region = 105 }
  0xb8   :  { %410 = vsyncpa [#allocation3], 1 }
  0xb9   :  { %412 = vsyncpa [#allocation3 + $0x1], 1 }
  0xba   :  { %413 = vsyncpa [#allocation4], 1 }
  0xbb   :  { %415 = vsyncpa [#allocation4 + $0x1], 1 }
  0xbc   :  { %416 = vsyncpa [#allocation9], 1 }
  0xbd   :  { %418 = vsyncpa [#allocation9 + $0x1], 1 }
  0xbe   :  { %419 = vsyncpa [#allocation5], 1 }
  0xbf   :  { %421 = vsyncpa [#allocation5 + $0x1], 1 }

</bundles_post_ra>
